<compile_context>
chip_gen: v7x
topology: tpu7x:2x2x1
jax: 0.10.0
libtpu: 0.0.40
codegen_flags: <defaults>
</compile_context>

<pallas_src>
import functools

import jax
import jax.numpy as jnp
import numpy as np
from jax.experimental import pallas as pl
from jax.experimental.pallas import tpu as pltpu

BN_EPS = 1e-5


def _round_up(v, m):
  return ((v + m - 1) // m) * m


# ----------------------------- fused Pallas kernel ----------------------------- #

def _fused_backbone_head_kernel(
    tap_ref,                                    # (1, bblk*m_pad, kpack) bf16
    w_stem, b_stem, w_exp, b_exp, w_proj, b_proj, w_hc, b_hc, w_fc, b_fc,
    o_ref,                                      # (1, bblk, ncls_pad) f32
    *, bblk, m, m_pad):
  """stem 3x3/s2 (packed-K matmul) -> 1x1 expand -> 1x1 project -> 1x1 head
  conv -> per-image GAP -> folded BatchNorm1d + Linear head.

  One grid step == bblk images. All BN folded into weights/biases. Activations
  never leave VMEM; only the (bblk, 128) lane-dense logits slab goes to HBM.
  """

  def silu(v):
    return v * jax.nn.sigmoid(v)

  x = tap_ref[0]                                # (bblk*m_pad, kpack) bf16

  # --- stem 3x3/s2 conv == one matmul over the packed im2col operand (+BN, SiLU)
  y = silu(jnp.dot(x, w_stem[...], preferred_element_type=jnp.float32)
           + b_stem[...])
  # --- 1x1 expand (+folded BN, SiLU)
  y = silu(jnp.dot(y.astype(jnp.bfloat16), w_exp[...],
                   preferred_element_type=jnp.float32) + b_exp[...])
  # --- 1x1 project (+folded BN, linear)
  y = jnp.dot(y.astype(jnp.bfloat16), w_proj[...],
              preferred_element_type=jnp.float32) + b_proj[...]
  # --- 1x1 head conv (+folded BN, SiLU)
  y = silu(jnp.dot(y.astype(jnp.bfloat16), w_hc[...],
                   preferred_element_type=jnp.float32) + b_hc[...])

  # --- global average pool per image over the ho*wo valid positions
  c_feat = y.shape[-1]
  y = y.reshape(bblk, m_pad, c_feat)
  if m_pad != m:       # zero out spatial padding rows before the pooled sum
    row = jax.lax.broadcasted_iota(jnp.int32, (1, m_pad, 1), 1)
    y = jnp.where(row < m, y, 0.0)
  feat = jnp.sum(y, axis=1) * (1.0 / m)         # (bblk, c_feat) f32

  # --- head: folded BatchNorm1d -> Dropout (identity, eval) -> Linear (pad 128)
  logits = jnp.dot(feat.astype(jnp.bfloat16), w_fc[...],
                   preferred_element_type=jnp.float32) + b_fc[...]
  o_ref[0] = logits.astype(o_ref.dtype)


# --------------------------------- JAX wrapper --------------------------------- #

def _fold_bn_into_weight(w, bn):
  """Fold an inference BatchNorm into the preceding (K, C_out) weight."""
  s = bn["gamma"] * jax.lax.rsqrt(bn["var"] + BN_EPS)       # per output channel
  bias = (bn["beta"] - bn["mean"] * s).reshape(1, -1).astype(jnp.float32)
  return (w * s).astype(jnp.bfloat16), bias


def _const_spec(a):
  """Grid-invariant block (same block every step -> DMA'd once)."""
  # TODO(synk): pipeline_mode=pl.Buffered(1) would reclaim the (tiny) double
  # buffer for these constant blocks on v7x; left at default for portability.
  return pl.BlockSpec(a.shape, lambda i: (0, 0))


def _choose_bblk(n, m_pad, kpack, c_sum):
  """Images per grid step: fill VMEM / MXU M without starving megacore."""
  per_img = m_pad * (2 * 2 * kpack          # bf16 packed taps, double-buffered
                     + (4 + 2) * c_sum)     # f32 activations + bf16 casts
  budget = 20 << 20                         # conservative across v5e/v6e/v7x
  bblk = max(1, min(n, budget // max(per_img, 1)))
  if n >= 2:                                # keep grid >= 2 -> both TensorCores
    bblk = min(bblk, -(-n // 2))
  return int(bblk)


def efficientnet_vehicle_forward(x_nchw, p):
  n, cin, h, w = x_nchw.shape
  cstem = p["stem_w"].shape[0]
  c_mid = p["exp_w"].shape[0]
  c_proj = p["proj_w"].shape[0]
  c_feat = p["headc_w"].shape[0]
  num_classes = p["fc_w"].shape[0]

  ho = (h + 2 - 3) // 2 + 1
  wo = (w + 2 - 3) // 2 + 1
  m = ho * wo
  m_pad = _round_up(m, 8)
  kpack_raw = 9 * cin
  kpack = _round_up(kpack_raw, 8)
  ncls_pad = _round_up(max(num_classes, 1), 128)      # lane-dense output slab

  bblk = _choose_bblk(n, m_pad, kpack, cstem + c_mid + c_proj + c_feat)
  n_pad = _round_up(n, bblk)
  grid = n_pad // bblk

  # ---- trace-time parameter prep (runs once under jit, outside the kernel) ----
  # stem: OIHW -> (kh, kw, cin, cstem) -> packed (9*cin, cstem); BN folded.
  w_stem = jnp.transpose(p["stem_w"], (2, 3, 1, 0)).reshape(kpack_raw, cstem)
  w_stem = jnp.pad(w_stem, ((0, kpack - kpack_raw), (0, 0)))
  w_stem, b_stem = _fold_bn_into_weight(w_stem, p["stem_bn"])
  w_exp, b_exp = _fold_bn_into_weight(p["exp_w"][:, :, 0, 0].T, p["exp_bn"])
  w_proj, b_proj = _fold_bn_into_weight(p["proj_w"][:, :, 0, 0].T, p["proj_bn"])
  w_hc, b_hc = _fold_bn_into_weight(p["headc_w"][:, :, 0, 0].T, p["headc_bn"])

  # head: fold BatchNorm1d (eval running stats) into the Linear; pad to 128.
  b1 = p["bn1d"]
  s1 = b1["gamma"] * jax.lax.rsqrt(b1["var"] + BN_EPS)
  w_fc = s1[:, None] * p["fc_w"].T                                # (c_feat, ncls)
  b_fc = ((b1["beta"] - b1["mean"] * s1) @ p["fc_w"].T
          + p["fc_b"]).reshape(1, -1)
  w_fc = jnp.pad(w_fc, ((0, 0), (0, ncls_pad - num_classes))).astype(jnp.bfloat16)
  b_fc = jnp.pad(b_fc, ((0, 0), (0, ncls_pad - num_classes))).astype(jnp.float32)

  # ---- input prep: one packed im2col operand for the 3x3/s2 stem conv. ----
  # TODO(synk): for very large images this prep (transpose/pad/9 slices/concat)
  # is an extra HBM pass; building the taps in-kernel via strided DMA from a
  # pl.ANY padded image would remove it.
  x = jnp.transpose(x_nchw, (0, 2, 3, 1)).astype(jnp.float32)     # NHWC
  xp = jnp.pad(x, ((0, 0), (1, 1), (1, 1), (0, 0)))
  taps = []
  for di in range(3):                   # packed channel order t = di*3 + dj
    for dj in range(3):                 # matches the w_stem reshape above
      taps.append(xp[:, di:di + 2 * (ho - 1) + 1:2,
                     dj:dj + 2 * (wo - 1) + 1:2, :])
  packed = jnp.concatenate(taps, axis=-1).reshape(n, m, kpack_raw)
  packed = jnp.pad(packed,
                   ((0, n_pad - n), (0, m_pad - m), (0, kpack - kpack_raw)))
  packed = packed.astype(jnp.bfloat16).reshape(grid, bblk * m_pad, kpack)

  weights = (w_stem, b_stem, w_exp, b_exp, w_proj, b_proj, w_hc, b_hc, w_fc, b_fc)

  out = pl.pallas_call(
      functools.partial(_fused_backbone_head_kernel,
                        bblk=bblk, m=m, m_pad=m_pad),
      out_shape=jax.ShapeDtypeStruct((grid, bblk, ncls_pad), jnp.float32),
      grid=(grid,),
      in_specs=[pl.BlockSpec((1, bblk * m_pad, kpack), lambda i: (i, 0, 0))]
               + [_const_spec(a) for a in weights],
      out_specs=pl.BlockSpec((1, bblk, ncls_pad), lambda i: (i, 0, 0)),
      compiler_params=pltpu.CompilerParams(
          dimension_semantics=("parallel",),
          vmem_limit_bytes=48 * 1024 * 1024),
  )(packed, *weights)

  return out.reshape(n_pad, ncls_pad)[:n, :num_classes]


# ------------------------------ parameter helpers ------------------------------ #

def init_bn(key, c):
  k0, k1, k2, k3 = jax.random.split(key, 4)
  return {
      "gamma": 1.0 + 0.1 * jax.random.normal(k0, (c,), jnp.float32),
      "beta": 0.05 * jax.random.normal(k1, (c,), jnp.float32),
      "mean": 0.02 * jax.random.normal(k2, (c,), jnp.float32),
      "var": 1.0 + 0.1 * jnp.abs(jax.random.normal(k3, (c,), jnp.float32)),
  }


def init_params(key, cin=3, c_stem=16, c_mid=32, c_proj=24, c_feat=64,
                num_classes=7):
  ks = jax.random.split(key, 10)
  w = lambda k, shape: 0.1 * jax.random.normal(k, shape, jnp.float32)
  return {
      "stem_w": w(ks[0], (c_stem, cin, 3, 3)),         # PyTorch OIHW
      "stem_bn": init_bn(ks[1], c_stem),
      "exp_w": w(ks[2], (c_mid, c_stem, 1, 1)),
      "exp_bn": init_bn(ks[3], c_mid),
      "proj_w": w(ks[4], (c_proj, c_mid, 1, 1)),
      "proj_bn": init_bn(ks[5], c_proj),
      "headc_w": w(ks[6], (c_feat, c_proj, 1, 1)),
      "headc_bn": init_bn(ks[7], c_feat),
      "bn1d": init_bn(ks[8], c_feat),                  # nn.BatchNorm1d(num_features)
      "fc_w": w(ks[9], (num_classes, c_feat)),         # nn.Linear weight (out, in)
      "fc_b": jnp.zeros((num_classes,), jnp.float32),
  }


# ----------------------------- pure-JAX f32 reference --------------------------- #

def reference_forward(x_nchw, p):
  x = jnp.transpose(x_nchw, (0, 2, 3, 1)).astype(jnp.float32)

  def bn(y, b):
    s = b["gamma"] / jnp.sqrt(b["var"] + BN_EPS)
    return y * s + (b["beta"] - b["mean"] * s)

  def silu(y):
    return y * jax.nn.sigmoid(y)

  w = jnp.transpose(p["stem_w"], (2, 3, 1, 0))                     # HWIO
  y = jax.lax.conv_general_dilated(
      x, w, window_strides=(2, 2), padding=((1, 1), (1, 1)),
      dimension_numbers=("NHWC", "HWIO", "NHWC"),
      precision=jax.lax.Precision.HIGHEST)
  y = silu(bn(y, p["stem_bn"]))
  y = silu(bn(jnp.einsum("nhwc,cd->nhwd", y, p["exp_w"][:, :, 0, 0].T), p["exp_bn"]))
  y = bn(jnp.einsum("nhwc,cd->nhwd", y, p["proj_w"][:, :, 0, 0].T), p["proj_bn"])
  y = silu(bn(jnp.einsum("nhwc,cd->nhwd", y, p["headc_w"][:, :, 0, 0].T),
              p["headc_bn"]))
  feat = jnp.mean(y, axis=(1, 2))
  b1 = p["bn1d"]
  xn = (feat - b1["mean"]) * (b1["gamma"] / jnp.sqrt(b1["var"] + BN_EPS)) + b1["beta"]
  return xn @ p["fc_w"].T + p["fc_b"]                  # dropout is identity (eval)


# ------------------------------------- main ------------------------------------- #

if __name__ == "__main__":
  key = jax.random.PRNGKey(0)
  k_params, k_x = jax.random.split(key)

  params = init_params(k_params, cin=3, num_classes=7)
  x = jax.random.normal(k_x, (2, 3, 16, 16), jnp.float32)   # NCHW, PyTorch style

  out = jax.jit(efficientnet_vehicle_forward)(x, params)
  out = jax.block_until_ready(out)

  ref = reference_forward(x, params)
  # bf16 MXU operands with f32 accumulation -> relaxed tolerance vs f32 reference.
  np.testing.assert_allclose(np.asarray(out), np.asarray(ref), rtol=2e-2, atol=2e-2)
  print("KERNEL_OK")
</pallas_src>

<mosaic_0001>
module attributes {stable_mosaic.version = 11 : i64} {
  func.func @_fused_backbone_head_kernel(%arg0: i32, %arg1: memref<1x64x32xbf16, #tpu.memory_space<vmem>>, %arg2: memref<32x16xbf16, #tpu.memory_space<vmem>>, %arg3: memref<1x16xf32, #tpu.memory_space<vmem>>, %arg4: memref<16x32xbf16, #tpu.memory_space<vmem>>, %arg5: memref<1x32xf32, #tpu.memory_space<vmem>>, %arg6: memref<32x24xbf16, #tpu.memory_space<vmem>>, %arg7: memref<1x24xf32, #tpu.memory_space<vmem>>, %arg8: memref<24x64xbf16, #tpu.memory_space<vmem>>, %arg9: memref<1x64xf32, #tpu.memory_space<vmem>>, %arg10: memref<64x128xbf16, #tpu.memory_space<vmem>>, %arg11: memref<1x128xf32, #tpu.memory_space<vmem>>, %arg12: memref<1x1x128xf32, #tpu.memory_space<vmem>>) attributes {dimension_semantics = [#tpu.dimension_semantics<parallel>], iteration_bounds = array<i64: 2>, scalar_prefetch = 0 : i64, scratch_operands = 0 : i64, tpu.core_type = #tpu.core_type<tc>, window_params = [{transform_indices = @transform_0, window_bounds = array<i64: 1, 64, 32>}, {pipeline_mode = #tpu.pipeline_mode<synchronous>, transform_indices = @transform_1, window_bounds = array<i64: 32, 16>}, {pipeline_mode = #tpu.pipeline_mode<synchronous>, transform_indices = @transform_2, window_bounds = array<i64: 1, 16>}, {pipeline_mode = #tpu.pipeline_mode<synchronous>, transform_indices = @transform_3, window_bounds = array<i64: 16, 32>}, {pipeline_mode = #tpu.pipeline_mode<synchronous>, transform_indices = @transform_4, window_bounds = array<i64: 1, 32>}, {pipeline_mode = #tpu.pipeline_mode<synchronous>, transform_indices = @transform_5, window_bounds = array<i64: 32, 24>}, {pipeline_mode = #tpu.pipeline_mode<synchronous>, transform_indices = @transform_6, window_bounds = array<i64: 1, 24>}, {pipeline_mode = #tpu.pipeline_mode<synchronous>, transform_indices = @transform_7, window_bounds = array<i64: 24, 64>}, {pipeline_mode = #tpu.pipeline_mode<synchronous>, transform_indices = @transform_8, window_bounds = array<i64: 1, 64>}, {pipeline_mode = #tpu.pipeline_mode<synchronous>, transform_indices = @transform_9, window_bounds = array<i64: 64, 128>}, {pipeline_mode = #tpu.pipeline_mode<synchronous>, transform_indices = @transform_10, window_bounds = array<i64: 1, 128>}, {transform_indices = @transform_11, window_bounds = array<i64: 1, 1, 128>}]} {
    %c0 = arith.constant 0 : index
    %c0_0 = arith.constant 0 : index
    %c0_1 = arith.constant 0 : index
    %0 = vector.load %arg1[%c0, %c0_0, %c0_1] : memref<1x64x32xbf16, #tpu.memory_space<vmem>>, vector<1x64x32xbf16>
    %1 = vector.shape_cast %0 : vector<1x64x32xbf16> to vector<64x32xbf16>
    %c0_2 = arith.constant 0 : index
    %c0_3 = arith.constant 0 : index
    %2 = vector.load %arg2[%c0_2, %c0_3] : memref<32x16xbf16, #tpu.memory_space<vmem>>, vector<32x16xbf16>
    %cst = arith.constant dense<0.000000e+00> : vector<64x16xf32>
    %3 = tpu.matmul %1, %2, %cst {dimension_numbers = #tpu.dot_dimension_numbers<[1], [0], [0], [1], [0, 0, 1, 1], [], []>} : vector<64x32xbf16>, vector<32x16xbf16>, vector<64x16xf32> -> vector<64x16xf32>
    %c0_4 = arith.constant 0 : index
    %c0_5 = arith.constant 0 : index
    %4 = vector.load %arg3[%c0_4, %c0_5] : memref<1x16xf32, #tpu.memory_space<vmem>>, vector<1x16xf32>
    %5 = vector.broadcast %4 : vector<1x16xf32> to vector<64x16xf32>
    %6 = arith.addf %3, %5 : vector<64x16xf32>
    %7 = arith.negf %6 : vector<64x16xf32>
    %8 = math.exp %7 : vector<64x16xf32>
    %cst_6 = arith.constant 1.000000e+00 : f32
    %9 = vector.broadcast %cst_6 : f32 to vector<64x16xf32>
    %10 = arith.addf %9, %8 : vector<64x16xf32>
    %11 = arith.divf %9, %10 : vector<64x16xf32>
    %12 = arith.mulf %6, %11 : vector<64x16xf32>
    %13 = arith.truncf %12 : vector<64x16xf32> to vector<64x16xbf16>
    %c0_7 = arith.constant 0 : index
    %c0_8 = arith.constant 0 : index
    %14 = vector.load %arg4[%c0_7, %c0_8] : memref<16x32xbf16, #tpu.memory_space<vmem>>, vector<16x32xbf16>
    %cst_9 = arith.constant dense<0.000000e+00> : vector<64x32xf32>
    %15 = tpu.matmul %13, %14, %cst_9 {dimension_numbers = #tpu.dot_dimension_numbers<[1], [0], [0], [1], [0, 0, 1, 1], [], []>} : vector<64x16xbf16>, vector<16x32xbf16>, vector<64x32xf32> -> vector<64x32xf32>
    %c0_10 = arith.constant 0 : index
    %c0_11 = arith.constant 0 : index
    %16 = vector.load %arg5[%c0_10, %c0_11] : memref<1x32xf32, #tpu.memory_space<vmem>>, vector<1x32xf32>
    %17 = vector.broadcast %16 : vector<1x32xf32> to vector<64x32xf32>
    %18 = arith.addf %15, %17 : vector<64x32xf32>
    %19 = arith.negf %18 : vector<64x32xf32>
    %20 = math.exp %19 : vector<64x32xf32>
    %cst_12 = arith.constant 1.000000e+00 : f32
    %21 = vector.broadcast %cst_12 : f32 to vector<64x32xf32>
    %22 = arith.addf %21, %20 : vector<64x32xf32>
    %23 = arith.divf %21, %22 : vector<64x32xf32>
    %24 = arith.mulf %18, %23 : vector<64x32xf32>
    %25 = arith.truncf %24 : vector<64x32xf32> to vector<64x32xbf16>
    %c0_13 = arith.constant 0 : index
    %c0_14 = arith.constant 0 : index
    %26 = vector.load %arg6[%c0_13, %c0_14] : memref<32x24xbf16, #tpu.memory_space<vmem>>, vector<32x24xbf16>
    %cst_15 = arith.constant dense<0.000000e+00> : vector<64x24xf32>
    %27 = tpu.matmul %25, %26, %cst_15 {dimension_numbers = #tpu.dot_dimension_numbers<[1], [0], [0], [1], [0, 0, 1, 1], [], []>} : vector<64x32xbf16>, vector<32x24xbf16>, vector<64x24xf32> -> vector<64x24xf32>
    %c0_16 = arith.constant 0 : index
    %c0_17 = arith.constant 0 : index
    %28 = vector.load %arg7[%c0_16, %c0_17] : memref<1x24xf32, #tpu.memory_space<vmem>>, vector<1x24xf32>
    %29 = vector.broadcast %28 : vector<1x24xf32> to vector<64x24xf32>
    %30 = arith.addf %27, %29 : vector<64x24xf32>
    %31 = arith.truncf %30 : vector<64x24xf32> to vector<64x24xbf16>
    %c0_18 = arith.constant 0 : index
    %c0_19 = arith.constant 0 : index
    %32 = vector.load %arg8[%c0_18, %c0_19] : memref<24x64xbf16, #tpu.memory_space<vmem>>, vector<24x64xbf16>
    %cst_20 = arith.constant dense<0.000000e+00> : vector<64x64xf32>
    %33 = tpu.matmul %31, %32, %cst_20 {dimension_numbers = #tpu.dot_dimension_numbers<[1], [0], [0], [1], [0, 0, 1, 1], [], []>} : vector<64x24xbf16>, vector<24x64xbf16>, vector<64x64xf32> -> vector<64x64xf32>
    %c0_21 = arith.constant 0 : index
    %c0_22 = arith.constant 0 : index
    %34 = vector.load %arg9[%c0_21, %c0_22] : memref<1x64xf32, #tpu.memory_space<vmem>>, vector<1x64xf32>
    %35 = vector.broadcast %34 : vector<1x64xf32> to vector<64x64xf32>
    %36 = arith.addf %33, %35 : vector<64x64xf32>
    %37 = arith.negf %36 : vector<64x64xf32>
    %38 = math.exp %37 : vector<64x64xf32>
    %cst_23 = arith.constant 1.000000e+00 : f32
    %39 = vector.broadcast %cst_23 : f32 to vector<64x64xf32>
    %40 = arith.addf %39, %38 : vector<64x64xf32>
    %41 = arith.divf %39, %40 : vector<64x64xf32>
    %42 = arith.mulf %36, %41 : vector<64x64xf32>
    %43 = vector.shape_cast %42 : vector<64x64xf32> to vector<1x64x64xf32>
    %cst_24 = arith.constant dense<0.000000e+00> : vector<1x64xf32>
    %44 = vector.multi_reduction <add>, %43, %cst_24 [1] : vector<1x64x64xf32> to vector<1x64xf32>
    %cst_25 = arith.constant 1.562500e-02 : f32
    %45 = vector.broadcast %cst_25 : f32 to vector<1x64xf32>
    %46 = arith.mulf %44, %45 : vector<1x64xf32>
    %47 = arith.truncf %46 : vector<1x64xf32> to vector<1x64xbf16>
    %c0_26 = arith.constant 0 : index
    %c0_27 = arith.constant 0 : index
    %48 = vector.load %arg10[%c0_26, %c0_27] : memref<64x128xbf16, #tpu.memory_space<vmem>>, vector<64x128xbf16>
    %cst_28 = arith.constant dense<0.000000e+00> : vector<1x128xf32>
    %49 = tpu.matmul %47, %48, %cst_28 {dimension_numbers = #tpu.dot_dimension_numbers<[1], [0], [0], [1], [0, 0, 1, 1], [], []>} : vector<1x64xbf16>, vector<64x128xbf16>, vector<1x128xf32> -> vector<1x128xf32>
    %c0_29 = arith.constant 0 : index
    %c0_30 = arith.constant 0 : index
    %50 = vector.load %arg11[%c0_29, %c0_30] : memref<1x128xf32, #tpu.memory_space<vmem>>, vector<1x128xf32>
    %51 = arith.addf %49, %50 : vector<1x128xf32>
    %c0_31 = arith.constant 0 : index
    %c0_32 = arith.constant 0 : index
    %c0_33 = arith.constant 0 : index
    %52 = vector.load %arg12[%c0_31, %c0_32, %c0_33] : memref<1x1x128xf32, #tpu.memory_space<vmem>>, vector<1x1x128xf32>
    %53 = vector.shape_cast %52 : vector<1x1x128xf32> to vector<1x128xf32>
    %54 = vector.shape_cast %51 : vector<1x128xf32> to vector<1x1x128xf32>
    tpu.vector_store %arg12[%c0_31, %c0_32, %c0_33], %54 {strides = array<i32>} : memref<1x1x128xf32, #tpu.memory_space<vmem>>, vector<1x1x128xf32>,
    return
  }
  func.func @transform_0(%arg0: i32) -> (i32, i32, i32) {
    %c0_i32 = arith.constant 0 : i32
    %c0_i32_0 = arith.constant 0 : i32
    %c0_i32_1 = arith.constant 0 : i32
    return %arg0, %c0_i32, %c0_i32_0 : i32, i32, i32
  }
  func.func @transform_1(%arg0: i32) -> (i32, i32) {
    %c0_i32 = arith.constant 0 : i32
    %c0_i32_0 = arith.constant 0 : i32
    %c0_i32_1 = arith.constant 0 : i32
    return %c0_i32, %c0_i32_0 : i32, i32
  }
  func.func @transform_2(%arg0: i32) -> (i32, i32) {
    %c0_i32 = arith.constant 0 : i32
    %c0_i32_0 = arith.constant 0 : i32
    %c0_i32_1 = arith.constant 0 : i32
    return %c0_i32, %c0_i32_0 : i32, i32
  }
  func.func @transform_3(%arg0: i32) -> (i32, i32) {
    %c0_i32 = arith.constant 0 : i32
    %c0_i32_0 = arith.constant 0 : i32
    %c0_i32_1 = arith.constant 0 : i32
    return %c0_i32, %c0_i32_0 : i32, i32
  }
  func.func @transform_4(%arg0: i32) -> (i32, i32) {
    %c0_i32 = arith.constant 0 : i32
    %c0_i32_0 = arith.constant 0 : i32
    %c0_i32_1 = arith.constant 0 : i32
    return %c0_i32, %c0_i32_0 : i32, i32
  }
  func.func @transform_5(%arg0: i32) -> (i32, i32) {
    %c0_i32 = arith.constant 0 : i32
    %c0_i32_0 = arith.constant 0 : i32
    %c0_i32_1 = arith.constant 0 : i32
    return %c0_i32, %c0_i32_0 : i32, i32
  }
  func.func @transform_6(%arg0: i32) -> (i32, i32) {
    %c0_i32 = arith.constant 0 : i32
    %c0_i32_0 = arith.constant 0 : i32
    %c0_i32_1 = arith.constant 0 : i32
    return %c0_i32, %c0_i32_0 : i32, i32
  }
  func.func @transform_7(%arg0: i32) -> (i32, i32) {
    %c0_i32 = arith.constant 0 : i32
    %c0_i32_0 = arith.constant 0 : i32
    %c0_i32_1 = arith.constant 0 : i32
    return %c0_i32, %c0_i32_0 : i32, i32
  }
  func.func @transform_8(%arg0: i32) -> (i32, i32) {
    %c0_i32 = arith.constant 0 : i32
    %c0_i32_0 = arith.constant 0 : i32
    %c0_i32_1 = arith.constant 0 : i32
    return %c0_i32, %c0_i32_0 : i32, i32
  }
  func.func @transform_9(%arg0: i32) -> (i32, i32) {
    %c0_i32 = arith.constant 0 : i32
    %c0_i32_0 = arith.constant 0 : i32
    %c0_i32_1 = arith.constant 0 : i32
    return %c0_i32, %c0_i32_0 : i32, i32
  }
  func.func @transform_10(%arg0: i32) -> (i32, i32) {
    %c0_i32 = arith.constant 0 : i32
    %c0_i32_0 = arith.constant 0 : i32
    %c0_i32_1 = arith.constant 0 : i32
    return %c0_i32, %c0_i32_0 : i32, i32
  }
  func.func @transform_11(%arg0: i32) -> (i32, i32, i32) {
    %c0_i32 = arith.constant 0 : i32
    %c0_i32_0 = arith.constant 0 : i32
    %c0_i32_1 = arith.constant 0 : i32
    return %arg0, %c0_i32, %c0_i32_0 : i32, i32, i32
  }
}

</mosaic_0001>

<bundles_post_ra>
// kernel: efficientnet_vehicle_forward.1
= control target key start
LH: loop header
LB: loop body
LE: loop exit
PB: predicated region body
PF: predicated region fallthrough
CT: control target
= control target key end

     0   :  { %16 = vsyncpa [#allocation3], 0  ;;  %s1758_s0 = inlined_call_operand.vmem [shape: bf16[2,64,32], index: 0, kind: input, shape index: {}]   ;;  %s1759_s1 = inlined_call_operand.vmem [shape: bf16[32,16], index: 1, kind: input, shape index: {}]   ;;  %s1760_s2 = inlined_call_operand.vmem [shape: f32[1,16], index: 2, kind: input, shape index: {}]   ;;  %s1761_s3 = inlined_call_operand.vmem [shape: bf16[16,32], index: 3, kind: input, shape index: {}]   ;;  %s1762_s4 = inlined_call_operand.vmem [shape: f32[1,32], index: 4, kind: input, shape index: {}]   ;;  %s1763_s5 = inlined_call_operand.vmem [shape: bf16[32,24], index: 5, kind: input, shape index: {}]   ;;  %s1764_s6 = inlined_call_operand.vmem [shape: f32[1,24], index: 6, kind: input, shape index: {}]   ;;  %s1765_s7 = inlined_call_operand.vmem [shape: bf16[24,64], index: 7, kind: input, shape index: {}]   ;;  %s1766_s8 = inlined_call_operand.vmem [shape: f32[1,64], index: 8, kind: input, shape index: {}]   ;;  %s1767_s9 = inlined_call_operand.vmem [shape: bf16[64,128], index: 9, kind: input, shape index: {}]   ;;  %s1768_s10 = inlined_call_operand.vmem [shape: f32[1,128], index: 10, kind: input, shape index: {}]   ;;  %s1769_s11 = inlined_call_operand.hbm [shape: f32[2,1,128], index: 11, kind: output, shape index: {}]  }
   0x1   :  { %18 = vsyncpa [#allocation3 + $0x1], 0  ;;  %s1593_s17 = smov 0   ;;  %s1595_s18 = smov 0  }
   0x2   :  { %s1597_s19 = smov 0   ;;  %s1599_s20 = smov 0  }
   0x3 LB: > { %s1614_s21 = sadd.s32 4294967295, %s1528_s20   ;;  %s1157_s22 = sadd.s32 4294967294, %s1528_s20   ;;  %s1528_s20 = sphi %s1599_s20, %s1775_s20   ;;  %s1524_s19 = sphi %s1597_s19, %s1774_s19   ;;  %s1520_s18 = sphi %s1595_s18, %s1773_s18   ;;  %s1516_s17 = sphi %s1593_s17, %s1772_s17  }
   0x4   : > { %s1618_s23 = sadd.s32 1, %s1528_s20   ;;  %s267_s24 = sadd.s32 1, %s1524_s19 }
   0x5   : > { %s264_s25 = ssub.s32 %s1528_s20, %s1618_s23  ;;  %p277_p0 = scmp.ne.s32.totalorder %s1524_s19, %s1520_s18 }
   0x6   : > { %p265_p1 = scmp.eq.s32.totalorder %s264_s25, 0  ;;  %p278_p2 = scmp.eq.s32.totalorder %s1614_s21, 1 }
   0x7   : > { %p283_p3 = scmp.ne.s32.totalorder %s1520_s18, %s1516_s17  ;;  %p284_p4 = scmp.eq.s32.totalorder %s1157_s22, 1 }
   0x8   : > { %s1629_s26 = scalar_select %p265_p1, %s1524_s19, %s267_s24  }
   0x9   : > { %p1631_p5 = por %p278_p2, %p277_p0  ;;  %p1635_p6 = por %p284_p4, %p283_p3 }
   0xa   : > { %p1160_p7 = scmp.ge.s32.totalorder %s1528_s20, 1  ;;  %p340_p8 = scmp.lt.s32.totalorder %s1528_s20, 3 }
   0xc   : > { %p341_p9 = pnand %p1160_p7, %p340_p8 }
   0xd   : > { %v1355_v0 = vld [vmem:[%s1759_s1] sm:$0xff] (!%p341_p9)   ;;  %p379_p10 = scmp.lt.s32.totalorder (!%p341_p9), %s1614_s21, 1  ;;  %v1356_v1 = vld [vmem:[%s1759_s1 + $0x8] sm:$0xff] (!%p341_p9)   ;;  %vm436_vm0 = vcmask (!%p341_p9), 261120   ;;  %vm589_vm1 = vcmask (!%p341_p9), 130048   ;;  %vm863_vm2 = vcmask (!%p341_p9), 1043456  }
   0xe   : > { %344 = sbr.rel (%p341_p9) target bundleno = 1247 (0x4df), region = 64  ;;  %1255 = vmatprep.subr.bf16.mxu0 (!%p341_p9), %v1355_v0  ;;  %v1361_v6 = vld [vmem:[%s1761_s3] sm:$0xff] (!%p341_p9)   ;;  %vm850_vm3 = vcmask (!%p341_p9), 195584   ;;  %vm1531_vm4 = vmmov (!%p341_p9), 0   ;;  %vm988_vm5 = vcmask (!%p341_p9), 523264   ;;  %s1532_s16 = smov (!%p341_p9), [#allocation2]  }
   0xf   : > { %1256 = vmatpush3.bf16.msra.mxu0 (!%p341_p9), %v1355_v0  ;;  %1267 = vmatprep.subr.bf16.mxu1 (!%p341_p9), %v1361_v6  ;;  %v1163_v7 = vld [vmem:[%s1760_s2] ss:$0 sm:$0xff] (!%p341_p9)  ;;  %s1470_s22 = sshll.u32 (!%p341_p9), %s1532_s16, 4  ;;  %s1471_s22 = int_to_ptr.vmem [resolvable:$false] %s1470_s22 }
  0x10   : > { %1257 = vmatprep.subr.bf16.mxu0 (!%p341_p9), %v1356_v1  ;;  %1268 = vmatpush3.bf16.msra.mxu1 (!%p341_p9), %v1361_v6  ;;  %v1364_v6 = vld [vmem:[%s1765_s7] sm:$0xff] (!%p341_p9)   ;;  %s1472_s30 = scalar_lea.vmem (!%p341_p9), %s1471_s22, 32 }
  0x13   : > { %1258 = vmatpush3.bf16.msra.mxu0 (!%p341_p9), %v1356_v1 }
  0x14   : > { %1289 = vmatprep.subr.bf16.mxu0 (!%p341_p9), %v1364_v6 }
  0x15   : > { %s380_s14 = scalar_select %p379_p10, %s1614_s21, 1 }
  0x17   : > { %s1226_s15 = sshll.u32 %s380_s14, 5 }
  0x18   : > { %s383_s24 = scalar_lea.vmem %s1758_s0, %s1226_s15  ;;  %s377_s15 = sand.u32 1, %s1520_s18  }
  0x19   : > { %v1357_v2 = vld [vmem:[%s383_s24] sm:$0xff]   ;;  %v1358_v3 = vld [vmem:[%s383_s24 + $0x8] sm:$0xff]   ;;  %v1359_v4 = vld [vmem:[%s383_s24 + $0x10] sm:$0xff]   ;;  %s378_s25 = scalar_lea.vmem [#allocation2], %s377_s15  ;;  %s1090_s14 = scalar_lea.sflag [#allocation3], %s377_s15 }
  0x1a   : > { %1259 = vmatprep.mubr.msk.bf16.mxu0 %vm436_vm0, %v1357_v2  ;;  %v1360_v5 = vld [vmem:[%s383_s24 + $0x18] sm:$0xff]   ;;  %s1223_s24 = sshll.u32 %s1614_s21, 4  ;;  %s1102_s29 = sshll.u32 %s378_s25, 4  ;;  %s1718_s29 = int_to_ptr.vmem [resolvable:$true] %s1102_s29 }
  0x1b   : > { %1260 = vmatmul.mubr.msk.bf16.vlgmr.msra.gmra.mrb[0].mxu0 %vm436_vm0, %v1358_v3  ;;  %s1716_s13 = scalar_lea.hbm %s1769_s11, %s1223_s24  ;;  %s1466_s21 = scalar_lea.vmem %s1718_s29, 16 }
  0x1c   : > { %1263 = vmatprep.mubr.msk.bf16.mxu0 %vm436_vm0, %v1359_v4  ;;  %v1362_v4 = vld [vmem:[%s1763_s5] sm:$0xff]   ;;  %1290 = vmatpush3.bf16.msra.mxu0 %v1364_v6  ;;  %p1467_p11 = scmp.ne.s32.totalorder %s1718_s29, %s1466_s21  ;;  %p1473_p0 = scmp.lt.s32.totalorder %s1718_s29, %s1471_s22 }
  0x1d   : > { %1277 = vmatprep.subr.bf16.mxu1 %v1362_v4  ;;  %p1474_p1 = scmp.lt.s32.totalorder %s1472_s30, %s1466_s21 }
  0x1e   : > { %p1468_p12 = pnand %p1467_p11, %p1631_p5 }
  0x1f   : > { %p1475_p2 = por %p1474_p1, %p1473_p0 }
  0x20   : > { %p1469_p13 = pneg %p1468_p12 }
  0x22   : > { %p1476_p3 = pnand %p1475_p2, %p1469_p13 }
  0x23   : > { %1264 = vmatmul.mubr.msk.bf16.gmra.mrb[4].mxu0 %vm436_vm0, %v1360_v5  ;;  %v1363_v5 = vld [vmem:[%s1763_s5 + $0x8] sm:$0xff]  }
  0xee   : > { %v1261_v8 = vpop.f32.mrb[0].mxu0 }
  0xef   : > { %v492_v9 = vadd.f32 %v1261_v8, %v1163_v7  ;;  %v483_v10 = vpop.f32.mrb[1].mxu0 }
  0xf0   : > { %v484_v11 = vadd.f32 %v1163_v7, %v483_v10  ;;  %v1262_v12 = vpop.f32.mrb[2].mxu0 }
  0xf1   : > { %v1176_v13 = vmul.f32 -1.442695, %v492_v9  ;;  %v495_v14 = vadd.f32 %v1262_v12, %v1163_v7  ;;  %v486_v15 = vpop.f32.mrb[3].mxu0 }
  0xf2   : > { %v1174_v16 = vmul.f32 -1.442695, %v484_v11  ;;  %v487_v17 = vadd.f32 %v1163_v7, %v486_v15 }
  0xf3   : > { %1370 = vpow2.f32 %v1176_v13  ;;  %v1177_v18 = vmul.f32 -1.442695, %v495_v14 }
  0xf4   : > { %1372 = vpow2.f32 %v1174_v16  ;;  %v1175_v19 = vmul.f32 -1.442695, %v487_v17 }
  0xf5   : > { %1374 = vpow2.f32 %v1177_v18 }
  0xf6   : > { %1376 = vpow2.f32 %v1175_v19  ;;  %v1265_v20 = vpop.f32.mrb[4].mxu0 }
  0xf7   : > { %v508_v21 = vadd.f32 %v1265_v20, %v1163_v7  ;;  %v499_v22 = vpop.f32.mrb[5].mxu0 }
  0xf8   : > { %v500_v23 = vadd.f32 %v1163_v7, %v499_v22  ;;  %v1266_v24 = vpop.f32.mrb[6].mxu0 }
  0xf9   : > { %v1180_v25 = vmul.f32 -1.442695, %v508_v21  ;;  %v511_v26 = vadd.f32 %v1266_v24, %v1163_v7  ;;  %v502_v27 = vpop.f32.mrb[7].mxu0 }
  0xfa   : > { %v1178_v28 = vmul.f32 -1.442695, %v500_v23  ;;  %v503_v29 = vadd.f32 %v1163_v7, %v502_v27  ;;  %v1182_v7 = vld [vmem:[%s1762_s4] ss:$0 sm:$0xff] }
  0xfb   : > { %1378 = vpow2.f32 %v1180_v25  ;;  %v1181_v30 = vmul.f32 -1.442695, %v511_v26 }
  0xfc   : > { %1380 = vpow2.f32 %v1178_v28  ;;  %v1179_v31 = vmul.f32 -1.442695, %v503_v29 }
  0xfd   : > { %v1371_v32 = vpop.eup %1370  ;;  %1382 = vpow2.f32 %v1181_v30 }
  0xfe   : > { %v1373_v33 = vpop.eup %1372  ;;  %v540_v34 = vadd.f32 1.0, %v1371_v32  ;;  %1384 = vpow2.f32 %v1179_v31 }
  0xff   : > { %v1375_v35 = vpop.eup %1374  ;;  %v538_v36 = vadd.f32 1.0, %v1373_v33 }
 0x100   : > { %v1377_v37 = vpop.eup %1376  ;;  %1386 = vrcp.f32 %v540_v34  ;;  %v541_v38 = vadd.f32 1.0, %v1375_v35 }
 0x101   : > { %1388 = vrcp.f32 %v538_v36  ;;  %v539_v39 = vadd.f32 1.0, %v1377_v37 }
 0x102   : > { %1390 = vrcp.f32 %v541_v38 }
 0x103   : > { %1392 = vrcp.f32 %v539_v39 }
 0x105   : > { %v1379_v40 = vpop.eup %1378 }
 0x106   : > { %v1381_v41 = vpop.eup %1380  ;;  %v544_v42 = vadd.f32 1.0, %v1379_v40 }
 0x107   : > { %v1383_v43 = vpop.eup %1382  ;;  %v542_v44 = vadd.f32 1.0, %v1381_v41 }
 0x108   : > { %v1385_v45 = vpop.eup %1384  ;;  %1394 = vrcp.f32 %v544_v42  ;;  %v545_v46 = vadd.f32 1.0, %v1383_v43 }
 0x109   : > { %1396 = vrcp.f32 %v542_v44  ;;  %v543_v47 = vadd.f32 1.0, %v1385_v45 }
 0x10a   : > { %v1387_v48 = vpop.eup %1386  ;;  %1398 = vrcp.f32 %v545_v46 }
 0x10b   : > { %v1389_v49 = vpop.eup %1388  ;;  %1400 = vrcp.f32 %v543_v47  ;;  %v564_v52 = vmul.f32 %v1387_v48, %v492_v9 }
 0x10c   : > { %v1391_v50 = vpop.eup %1390  ;;  %v562_v54 = vmul.f32 %v1389_v49, %v484_v11 }
 0x10d   : > { %v1393_v51 = vpop.eup %1392  ;;  %v565_v53 = vmul.f32 %v1391_v50, %v495_v14 }
 0x10e   : > { %v563_v55 = vmul.f32 %v1393_v51, %v487_v17 }
 0x10f   : > { %v571_v56 = vpack.c.bf16 %v565_v53, %v564_v52 }
 0x110   : > { %v570_v57 = vpack.c.bf16 %v563_v55, %v562_v54 }
 0x112   : > { %v1395_v58 = vpop.eup %1394  ;;  %1269 = vmatprep.mubr.msk.bf16.mxu1 %vm589_vm1, %v570_v57 }
 0x113   : > { %v1397_v59 = vpop.eup %1396  ;;  %1270 = vmatmul.mubr.msk.bf16.vlgmr.msra.gmra.mrb[0].mxu1 %vm589_vm1, %v571_v56  ;;  %v568_v62 = vmul.f32 %v1395_v58, %v508_v21 }
 0x114   : > { %v1399_v60 = vpop.eup %1398  ;;  %v566_v0 = vmul.f32 %v1397_v59, %v500_v23  ;;  %1278 = vmatpush3.bf16.msra.mxu1 %v1362_v4  ;;  %v1365_v4 = vld [vmem:[%s1765_s7 + $0x8] ss:$0 sps:$4 sm:$0xff]  }
 0x115   : > { %v1401_v61 = vpop.eup %1400  ;;  %v569_v63 = vmul.f32 %v1399_v60, %v511_v26  ;;  %1279 = vmatprep.subr.bf16.mxu1 %v1363_v5  ;;  %1313 = vmatprep.subr.msk.bf16.mxu0 %vm863_vm2, %v1365_v4 }
 0x116   : > { %v567_v1 = vmul.f32 %v1401_v61, %v503_v29 }
 0x117   : > { %v573_v2 = vpack.c.bf16 %v569_v63, %v568_v62 }
 0x118   : > { %v572_v3 = vpack.c.bf16 %v567_v1, %v566_v0  ;;  %1280 = vmatpush3.bf16.msra.mxu1 %v1363_v5  ;;  %v865_v5 = vsel %vm863_vm2, %v1365_v4, 0 }
 0x119   : > { %1292 = vmatpush3.bf16.msra.mxu0 %v865_v5 }
 0x11a   : > { %1273 = vmatprep.mubr.msk.bf16.mxu1 %vm589_vm1, %v572_v3 }
 0x11b   : > { %1274 = vmatmul.mubr.msk.bf16.gmra.mrb[4].mxu1 %vm589_vm1, %v573_v2 }
 0x1e6   : > { %v1271_v8 = vpop.f32.mrb[0].mxu1 }
 0x1e7   : > { %v645_v9 = vadd.f32 %v1271_v8, %v1182_v7  ;;  %v636_v10 = vpop.f32.mrb[1].mxu1 }
 0x1e8   : > { %v637_v11 = vadd.f32 %v1182_v7, %v636_v10  ;;  %v1272_v12 = vpop.f32.mrb[2].mxu1 }
 0x1e9   : > { %v1190_v13 = vmul.f32 -1.442695, %v645_v9  ;;  %v648_v14 = vadd.f32 %v1272_v12, %v1182_v7  ;;  %v639_v15 = vpop.f32.mrb[3].mxu1 }
 0x1ea   : > { %v1188_v16 = vmul.f32 -1.442695, %v637_v11  ;;  %v640_v17 = vadd.f32 %v1182_v7, %v639_v15 }
 0x1eb   : > { %1402 = vpow2.f32 %v1190_v13  ;;  %v1191_v18 = vmul.f32 -1.442695, %v648_v14 }
 0x1ec   : > { %1404 = vpow2.f32 %v1188_v16  ;;  %v1189_v19 = vmul.f32 -1.442695, %v640_v17 }
 0x1ed   : > { %1406 = vpow2.f32 %v1191_v18 }
 0x1ee   : > { %1408 = vpow2.f32 %v1189_v19  ;;  %v1275_v20 = vpop.f32.mrb[4].mxu1 }
 0x1ef   : > { %v661_v21 = vadd.f32 %v1275_v20, %v1182_v7  ;;  %v652_v22 = vpop.f32.mrb[5].mxu1 }
 0x1f0   : > { %v653_v23 = vadd.f32 %v1182_v7, %v652_v22  ;;  %v1276_v24 = vpop.f32.mrb[6].mxu1 }
 0x1f1   : > { %v1194_v25 = vmul.f32 -1.442695, %v661_v21  ;;  %v664_v26 = vadd.f32 %v1276_v24, %v1182_v7  ;;  %v655_v27 = vpop.f32.mrb[7].mxu1 }
 0x1f2   : > { %v1192_v28 = vmul.f32 -1.442695, %v653_v23  ;;  %v656_v29 = vadd.f32 %v1182_v7, %v655_v27  ;;  %v1196_v7 = vld [vmem:[%s1764_s6] ss:$0 sm:$0xff] }
 0x1f3   : > { %1410 = vpow2.f32 %v1194_v25  ;;  %v1195_v30 = vmul.f32 -1.442695, %v664_v26  ;;  %v1366_v27 = vld [vmem:[%s1767_s9] sm:$0xff]  }
 0x1f4   : > { %1412 = vpow2.f32 %v1192_v28  ;;  %v1193_v31 = vmul.f32 -1.442695, %v656_v29  ;;  %v1530_v28 = vmov 0.0  }
 0x1f5   : > { %v1403_v32 = vpop.eup %1402  ;;  %1414 = vpow2.f32 %v1195_v30  ;;  %1301 = vmatprep.subr.bf16.mxu1 %v1530_v28  ;;  %v1368_v30 = vld [vmem:[%s1767_s9 + $0x10] sm:$0xff]  }
 0x1f6   : > { %v1405_v33 = vpop.eup %1404  ;;  %v693_v34 = vadd.f32 1.0, %v1403_v32  ;;  %1416 = vpow2.f32 %v1193_v31  ;;  %v1369_v31 = vld [vmem:[%s1767_s9 + $0x18] sm:$0xff]   ;;  %v1203_v32 = vld [vmem:[%s1766_s8] ss:$0 sm:$0xff] }
 0x1f7   : > { %v1407_v35 = vpop.eup %1406  ;;  %v691_v36 = vadd.f32 1.0, %v1405_v33 }
 0x1f8   : > { %v1409_v37 = vpop.eup %1408  ;;  %1418 = vrcp.f32 %v693_v34  ;;  %v694_v38 = vadd.f32 1.0, %v1407_v35 }
 0x1f9   : > { %1420 = vrcp.f32 %v691_v36  ;;  %v692_v39 = vadd.f32 1.0, %v1409_v37 }
 0x1fa   : > { %1422 = vrcp.f32 %v694_v38 }
 0x1fb   : > { %1424 = vrcp.f32 %v692_v39 }
 0x1fd   : > { %v1411_v40 = vpop.eup %1410 }
 0x1fe   : > { %v1413_v41 = vpop.eup %1412  ;;  %v697_v42 = vadd.f32 1.0, %v1411_v40 }
 0x1ff   : > { %v1415_v43 = vpop.eup %1414  ;;  %v695_v44 = vadd.f32 1.0, %v1413_v41 }
 0x200   : > { %v1417_v45 = vpop.eup %1416  ;;  %1426 = vrcp.f32 %v697_v42  ;;  %v698_v46 = vadd.f32 1.0, %v1415_v43 }
 0x201   : > { %1428 = vrcp.f32 %v695_v44  ;;  %v696_v47 = vadd.f32 1.0, %v1417_v45 }
 0x202   : > { %v1419_v48 = vpop.eup %1418  ;;  %1430 = vrcp.f32 %v698_v46 }
 0x203   : > { %v1421_v49 = vpop.eup %1420  ;;  %1432 = vrcp.f32 %v696_v47  ;;  %v717_v52 = vmul.f32 %v1419_v48, %v645_v9 }
 0x204   : > { %v1423_v50 = vpop.eup %1422  ;;  %v715_v54 = vmul.f32 %v1421_v49, %v637_v11 }
 0x205   : > { %v1425_v51 = vpop.eup %1424  ;;  %v718_v53 = vmul.f32 %v1423_v50, %v648_v14 }
 0x206   : > { %v716_v55 = vmul.f32 %v1425_v51, %v640_v17 }
 0x207   : > { %v724_v56 = vpack.c.bf16 %v718_v53, %v717_v52 }
 0x208   : > { %v723_v57 = vpack.c.bf16 %v716_v55, %v715_v54 }
 0x20a   : > { %v1427_v58 = vpop.eup %1426  ;;  %1281 = vmatprep.mubr.msk.bf16.mxu1 %vm436_vm0, %v723_v57 }
 0x20b   : > { %v1429_v59 = vpop.eup %1428  ;;  %1282 = vmatmul.mubr.msk.bf16.vlgmr.msra.gmra.mrb[8].mxu1 %vm436_vm0, %v724_v56  ;;  %v721_v62 = vmul.f32 %v1427_v58, %v661_v21 }
 0x20c   : > { %v1431_v60 = vpop.eup %1430  ;;  %v719_v0 = vmul.f32 %v1429_v59, %v653_v23  ;;  %1302 = vmatpush3.bf16.msra.mxu1 %v1366_v27 }
 0x20d   : > { %v1433_v61 = vpop.eup %1432  ;;  %v722_v63 = vmul.f32 %v1431_v60, %v664_v26  ;;  %1303 = vmatprep.subr.bf16.mxu1 %v1530_v28 }
 0x20e   : > { %v720_v1 = vmul.f32 %v1433_v61, %v656_v29  ;;  %v1367_v29 = vld [vmem:[%s1767_s9 + $0x8] sm:$0xff]  }
 0x20f   : > { %v726_v2 = vpack.c.bf16 %v722_v63, %v721_v62 }
 0x210   : > { %v725_v3 = vpack.c.bf16 %v720_v1, %v719_v0  ;;  %1304 = vmatpush3.bf16.msra.mxu1 %v1367_v29 }
 0x211   : > { %1305 = vmatprep.subr.bf16.mxu1 %v1530_v28 }
 0x212   : > { %1285 = vmatprep.mubr.msk.bf16.mxu1 %vm436_vm0, %v725_v3 }
 0x213   : > { %1286 = vmatmul.mubr.msk.bf16.gmra.mrb[12].mxu1 %vm436_vm0, %v726_v2 }
 0x214   : > { %1306 = vmatpush3.bf16.msra.mxu1 %v1368_v30  ;;  %1309 = vmatprep.mubr.msk.bf16.mxu1 %vm1531_vm4, %v1530_v28 }
 0x215   : > { %1307 = vmatprep.subr.bf16.mxu1 %v1530_v28 }
 0x218   : > { %1308 = vmatpush3.bf16.msra.mxu1 %v1369_v31 }
 0x2de   : > { %v1283_v6 = vpop.f32.mrb[8].mxu1 }
 0x2df   : > { %v796_v8 = vpop.f32.mrb[9].mxu1  ;;  %v805_v10 = vadd.f32 %v1283_v6, %v1196_v7 }
 0x2e0   : > { %v1284_v9 = vpop.f32.mrb[10].mxu1  ;;  %v797_v13 = vadd.f32 %v1196_v7, %v796_v8 }
 0x2e1   : > { %v808_v11 = vadd.f32 %v1284_v9, %v1196_v7  ;;  %v799_v12 = vpop.f32.mrb[11].mxu1 }
 0x2e2   : > { %v800_v14 = vadd.f32 %v1196_v7, %v799_v12 }
 0x2e3   : > { %v828_v15 = vpack.c.bf16 %v808_v11, %v805_v10 }
 0x2e4   : > { %v827_v16 = vpack.c.bf16 %v800_v14, %v797_v13 }
 0x2e6   : > { %v1287_v17 = vpop.f32.mrb[12].mxu1  ;;  %1293 = vmatprep.mubr.msk.bf16.mxu0 %vm850_vm3, %v827_v16 }
 0x2e7   : > { %v812_v18 = vpop.f32.mrb[13].mxu1  ;;  %1294 = vmatmul.mubr.msk.bf16.vlgmr.msra.gmra.mrb[8].mxu0 %vm850_vm3, %v828_v15  ;;  %v821_v20 = vadd.f32 %v1287_v17, %v1196_v7 }
 0x2e8   : > { %v1288_v19 = vpop.f32.mrb[14].mxu1  ;;  %v813_v23 = vadd.f32 %v1196_v7, %v812_v18 }
 0x2e9   : > { %v824_v21 = vadd.f32 %v1288_v19, %v1196_v7  ;;  %v815_v22 = vpop.f32.mrb[15].mxu1 }
 0x2ea   : > { %v816_v24 = vadd.f32 %v1196_v7, %v815_v22 }
 0x2eb   : > { %v830_v25 = vpack.c.bf16 %v824_v21, %v821_v20 }
 0x2ec   : > { %v829_v26 = vpack.c.bf16 %v816_v24, %v813_v23 }
 0x2ee   : > { %1297 = vmatprep.mubr.msk.bf16.mxu0 %vm850_vm3, %v829_v26 }
 0x2ef   : > { %1298 = vmatmul.mubr.msk.bf16.gmra.mrb[12].mxu0 %vm850_vm3, %v830_v25 }
 0x3ba   : > { %v1295_v33 = vpop.f32.mrb[8].mxu0 }
 0x3bb   : > { %v910_v34 = vadd.f32 %v1295_v33, %v1203_v32  ;;  %v901_v35 = vpop.f32.mrb[9].mxu0 }
 0x3bc   : > { %v902_v36 = vadd.f32 %v1203_v32, %v901_v35  ;;  %v1296_v37 = vpop.f32.mrb[10].mxu0 }
 0x3bd   : > { %v1212_v38 = vmul.f32 -1.442695, %v910_v34  ;;  %v913_v39 = vadd.f32 %v1296_v37, %v1203_v32  ;;  %v904_v40 = vpop.f32.mrb[11].mxu0 }
 0x3be   : > { %v1210_v41 = vmul.f32 -1.442695, %v902_v36  ;;  %v905_v42 = vadd.f32 %v1203_v32, %v904_v40 }
 0x3bf   : > { %1434 = vpow2.f32 %v1212_v38  ;;  %v1213_v43 = vmul.f32 -1.442695, %v913_v39 }
 0x3c0   : > { %1436 = vpow2.f32 %v1210_v41  ;;  %v1211_v44 = vmul.f32 -1.442695, %v905_v42 }
 0x3c1   : > { %1438 = vpow2.f32 %v1213_v43 }
 0x3c2   : > { %1440 = vpow2.f32 %v1211_v44  ;;  %v1299_v45 = vpop.f32.mrb[12].mxu0 }
 0x3c3   : > { %v926_v46 = vadd.f32 %v1299_v45, %v1203_v32  ;;  %v917_v47 = vpop.f32.mrb[13].mxu0 }
 0x3c4   : > { %v918_v48 = vadd.f32 %v1203_v32, %v917_v47  ;;  %v1300_v49 = vpop.f32.mrb[14].mxu0 }
 0x3c5   : > { %v1216_v50 = vmul.f32 -1.442695, %v926_v46  ;;  %v929_v51 = vadd.f32 %v1300_v49, %v1203_v32  ;;  %v920_v52 = vpop.f32.mrb[15].mxu0 }
 0x3c6   : > { %v1214_v53 = vmul.f32 -1.442695, %v918_v48  ;;  %v921_v54 = vadd.f32 %v1203_v32, %v920_v52 }
 0x3c7   : > { %1442 = vpow2.f32 %v1216_v50  ;;  %v1217_v55 = vmul.f32 -1.442695, %v929_v51 }
 0x3c8   : > { %1444 = vpow2.f32 %v1214_v53  ;;  %v1215_v56 = vmul.f32 -1.442695, %v921_v54 }
 0x3c9   : > { %v1435_v57 = vpop.eup %1434  ;;  %1446 = vpow2.f32 %v1217_v55 }
 0x3ca   : > { %v1437_v58 = vpop.eup %1436  ;;  %v958_v59 = vadd.f32 1.0, %v1435_v57  ;;  %1448 = vpow2.f32 %v1215_v56 }
 0x3cb   : > { %v1439_v60 = vpop.eup %1438  ;;  %v956_v61 = vadd.f32 1.0, %v1437_v58 }
 0x3cc   : > { %v1441_v62 = vpop.eup %1440  ;;  %1450 = vrcp.f32 %v958_v59  ;;  %v959_v63 = vadd.f32 1.0, %v1439_v60 }
 0x3cd   : > { %1452 = vrcp.f32 %v956_v61  ;;  %v957_v0 = vadd.f32 1.0, %v1441_v62 }
 0x3ce   : > { %1454 = vrcp.f32 %v959_v63 }
 0x3cf   : > { %1456 = vrcp.f32 %v957_v0 }
 0x3d1   : > { %v1443_v1 = vpop.eup %1442 }
 0x3d2   : > { %v1445_v2 = vpop.eup %1444  ;;  %v962_v3 = vadd.f32 1.0, %v1443_v1 }
 0x3d3   : > { %v1447_v4 = vpop.eup %1446  ;;  %v960_v5 = vadd.f32 1.0, %v1445_v2 }
 0x3d4   : > { %v1449_v6 = vpop.eup %1448  ;;  %1458 = vrcp.f32 %v962_v3  ;;  %v963_v7 = vadd.f32 1.0, %v1447_v4 }
 0x3d5   : > { %1460 = vrcp.f32 %v960_v5  ;;  %v961_v8 = vadd.f32 1.0, %v1449_v6 }
 0x3d6   : > { %v1451_v9 = vpop.eup %1450  ;;  %1462 = vrcp.f32 %v963_v7 }
 0x3d7   : > { %v1453_v10 = vpop.eup %1452  ;;  %1464 = vrcp.f32 %v961_v8  ;;  %v982_v14 = vmul.f32 %v1451_v9, %v910_v34 }
 0x3d8   : > { %v1455_v11 = vpop.eup %1454  ;;  %v980_v12 = vmul.f32 %v1453_v10, %v902_v36 }
 0x3d9   : > { %v1457_v13 = vpop.eup %1456  ;;  %v983_v17 = vmul.f32 %v1455_v11, %v913_v39  ;;  %v992_v21 = vsel %vm988_vm5, %v982_v14, 0.0 }
 0x3da   : > { %v981_v15 = vmul.f32 %v1457_v13, %v905_v42  ;;  %v989_v16 = vsel %vm988_vm5, %v980_v12, 0.0 }
 0x3db   : > { %v994_v25 = vsel %vm988_vm5, %v983_v17, 0.0 }
 0x3dc   : > { %v990_v18 = vsel %vm988_vm5, %v981_v15, 0.0 }
 0x3dd   : > { %v991_v19 = vadd.f32 %v990_v18, %v989_v16 }
 0x3de   : > { %v1459_v20 = vpop.eup %1458 }
 0x3df   : > { %v1461_v22 = vpop.eup %1460  ;;  %v993_v23 = vadd.f32 %v992_v21, %v991_v19  ;;  %v986_v29 = vmul.f32 %v1459_v20, %v926_v46 }
 0x3e0   : > { %v1463_v24 = vpop.eup %1462  ;;  %v984_v26 = vmul.f32 %v1461_v22, %v918_v48  ;;  %v1020_v48 = vld [vmem:[%s1768_s10] sm:$0x1] }
 0x3e1   : > { %v1465_v27 = vpop.eup %1464  ;;  %v995_v28 = vadd.f32 %v994_v25, %v993_v23  ;;  %v987_v33 = vmul.f32 %v1463_v24, %v929_v51  ;;  %v1000_v36 = vsel %vm988_vm5, %v986_v29, 0.0 }
 0x3e2   : > { %v996_v30 = vsel %vm988_vm5, %v984_v26, 0.0  ;;  %v985_v31 = vmul.f32 %v1465_v27, %v921_v54 }
 0x3e3   : > { %v997_v32 = vadd.f32 %v996_v30, %v995_v28  ;;  %v1002_v38 = vsel %vm988_vm5, %v987_v33, 0.0 }
 0x3e4   : > { %v998_v34 = vsel %vm988_vm5, %v985_v31, 0.0 }
 0x3e5   : > { %v999_v35 = vadd.f32 %v998_v34, %v997_v32 }
 0x3e7   : > { %v1001_v37 = vadd.f32 %v1000_v36, %v999_v35 }
 0x3e9   : > { %v1003_v39 = vadd.f32 %v1002_v38, %v1001_v37 }
 0x3eb   : > { %v1004_v40 = vrot.slane %v1003_v39, 4 }
 0x3ed   : > { %v1005_v41 = vadd.f32 %v1004_v40, %v1003_v39 }
 0x3ef   : > { %v1006_v42 = vrot.slane %v1005_v41, 2 }
 0x3f1   : > { %v1007_v43 = vadd.f32 %v1006_v42, %v1005_v41 }
 0x3f3   : > { %v1008_v44 = vrot.slane %v1007_v43, 1 }
 0x3f5   : > { %v1009_v45 = vadd.f32 %v1008_v44, %v1007_v43 }
 0x3f7   : > { %v1010_v46 = vmul.f32 0.015625, %v1009_v45 }
 0x3f9   : > { %v1011_v47 = vpack.c.bf16 %v1010_v46, %v1010_v46 }
 0x3fb   : > { %1310 = vmatmul.mubr.msk.bf16.vlgmr.msra.gmra.mrb[16].mxu1 %vm988_vm5, %v1011_v47 }
 0x4ce   : > { %v1082_v49 = vpop.f32.mrb[16].mxu1 }
 0x4cf   : > { %v1083_v50 = vadd.f32 %v1082_v49, %v1020_v48  ;;  %v1311_v51 = vpop.f32.mrb[17].mxu1 }
 0x4d0   : > { %v1085_v52 = vpop.f32.mrb[18].mxu1 }
 0x4d1   : > { %1088 = vst [vmem:[%s378_s25] sm:$0x1] %v1083_v50  ;;  %v1312_v53 = vpop.f32.mrb[19].mxu1 }
 0x4d2   : > { %1479 = shalt.err (!%p1476_p3)
}
 0x4d3   : > { %s1480_s15 = scalar_lea.hbm %s1716_s13, 16  ;;  %s1484_s12 = scalar_lea.hbm %s1769_s11, 32 }
 0x4d4   : > { %p1481_p4 = scmp.ne.s32.totalorder %s1716_s13, %s1480_s15  ;;  %p1485_p9 = scmp.lt.u32.totalorder %s1716_s13, %s1769_s11 }
 0x4d5   : > { %p1486_p10 = scmp.lt.u32.totalorder %s1484_s12, %s1480_s15  ;;  %p1488_p12 = scmp.lt.u32.totalorder %s1480_s15, %s1716_s13 }
 0x4d6   : > { %p1482_p7 = pnand %p1481_p4, %p1631_p5 }
 0x4d7   : > { %p1487_p11 = por %p1486_p10, %p1485_p9 }
 0x4d8   : > { %p1483_p8 = pneg %p1482_p7 }
 0x4d9   : > { %p1489_p13 = por %p1488_p12, %p1487_p11 }
 0x4db   : > { %p1490_p0 = pnand %p1489_p13, %p1483_p8 }
 0x4dd   : > { %1493 = shalt.err (!%p1490_p0)
}
 0x4de   : > { %1314 = dma.vmem_to_hbm [thread:$0]  (%p1631_p5), %s1718_s29, 16, %s1716_s13, %s1090_s14  }
 0x4df PF: > { %p1320_p1 = scmp.ge.s32.totalorder %s1528_s20, 2  ;;  %s1114_s21 = sand.u32 1, %s1516_s17  }
 0x4e0   : > { %s1115_s30 = scalar_lea.sflag [#allocation3], %s1114_s21 }
 0x4e1   : > { %p1317_p2 = pnand %p1320_p1, %p1635_p6 }
 0x4e3   : > { %1511 = dma.done.wait (!%p1317_p2), %s1115_s30, 16  }
 0x4e4   : > { %1513 = vsyncadd (!%p1317_p2), %s1115_s30, 4294967280  ;;  %p21_p3 = scmp.ge.s32.totalorder %s1618_s23, 4   ;;  %s1772_s17 = smov %s1520_s18 }
 0x4e5   : > { %s1773_s18 = smov %s1524_s19  ;;  %s1774_s19 = smov %s1629_s26 }
 0x4e6   : > { %s1775_s20 = smov %s1618_s23  ;;  %23 = sbr.rel (!%p21_p3) target bundleno = 3 (0x3), region = 99 }
 0x4ed   :  { %1119 = vsyncpa [#allocation3], 1 }
 0x4ee   :  { %1121 = vsyncpa [#allocation3 + $0x1], 1 }

</bundles_post_ra>
